<compile_context>
chip_gen: v7x
topology: tpu7x:2x2x1
jax: 0.10.0
libtpu: 0.0.40
codegen_flags: <defaults>
</compile_context>

<pallas_src>
import functools

import jax
import jax.numpy as jnp
from jax import lax
from jax.experimental import pallas as pl
from jax.experimental.pallas import tpu as pltpu

_EPS = 1e-5


def _dilated_wide_unit_kernel(
    pos_ref,                 # (1, N*L) int32: position inside each batch segment
    x_ref,                   # (C_in, N*L) bf16
    fcw_ref,                 # (C0p + C_out, C_in) bf16: [fconv ; cconv] rows
    fg_ref, fbe_ref,         # fconv BN gamma/beta (C0p, 1) f32
    cg_ref,                  # cconv BN gamma     (C_out, 1) f32
    dw_ref,                  # (num_layers, K*C0p, C0p) bf16, center tap first
    dg_ref, dbe_ref,         # dilated BN gamma/beta (num_layers, C0p, 1) f32
    ow_ref,                  # (C_out, C0p) bf16
    og_ref,                  # oconv BN gamma (C_out, 1) f32
    eg_ref, ebe_ref,         # end_norm BN gamma/beta (C_out, 1) f32
    o_ref,                   # (C_out, N*L)
    *, num_layers, c0p, layer_shifts, seg_len,
):
    nl = x_ref.shape[1]
    inv_count = 1.0 / float(nl)
    inv_layers = 1.0 / float(num_layers)
    pos = pos_ref[...]

    # Training-mode BN (stats over batch*length, biased variance), folded into
    # a per-channel scale/shift.  One-pass moments: var = E[y^2] - mean^2.
    def moments(y):
        mean = jnp.sum(y, axis=-1, keepdims=True) * inv_count
        msq = jnp.sum(y * y, axis=-1, keepdims=True) * inv_count
        return mean, msq - mean * mean

    def bn_scale_shift(y, gamma, beta):
        mean, var = moments(y)
        scale = gamma * lax.rsqrt(var + _EPS)
        return scale, beta - mean * scale

    def bn_scale(y, gamma):                       # shift dropped (cancels in end-BN)
        mean, var = moments(y)
        return gamma * lax.rsqrt(var + _EPS)

    # fconv + cconv fused: ONE MXU pass over x (bf16 operands, f32 accumulate).
    yfc = jnp.dot(fcw_ref[...], x_ref[...], preferred_element_type=jnp.float32)
    yf = yfc[:c0p, :]                             # (C0p,  N*L)
    yc = yfc[c0p:, :]                             # (C_out, N*L)

    sf, tf = bn_scale_shift(yf, fg_ref[...], fbe_ref[...])
    x_init = jnp.maximum(yf * sf + tf, 0.0)       # (C0p, N*L) f32
    x_init_bf = x_init.astype(jnp.bfloat16)

    acc = x_init
    for i in range(num_layers):
        # Dense per-layer matmul; tap shifts applied to the matmul OUTPUTS
        # (shift-then-matmul == matmul-then-shift for a per-lane contraction),
        # so no im2col slab / concatenate and no structural zeros on the MXU.
        yk = jnp.dot(dw_ref[i], x_init_bf,
                     preferred_element_type=jnp.float32)   # (K*C0p, N*L) f32
        yi = yk[:c0p, :]                                    # center tap, shift 0
        for j in range(1, len(layer_shifts[i])):
            sh = layer_shifts[i][j]
            blk = yk[j * c0p:(j + 1) * c0p, :]
            r = sh % nl
            if r != 0:
                blk = pltpu.roll(blk, r, axis=1)
            # Single comparison per shift: the other bound is vacuously true.
            mask = (pos >= sh) if sh > 0 else (pos < seg_len + sh)
            yi = yi + jnp.where(mask, blk, 0.0)
        si, ti = bn_scale_shift(yi, dg_ref[i], dbe_ref[i])
        acc = acc + (yi * si + ti)
    acc = jnp.maximum(acc * inv_layers, 0.0)

    # oconv / cconv branches: their post-BN per-channel shifts are constants
    # that the end-BN mean subtraction removes, so only scales are applied.
    yo = jnp.dot(ow_ref[...], acc.astype(jnp.bfloat16),
                 preferred_element_type=jnp.float32)        # (C_out, N*L) f32
    out = yc * bn_scale(yc, cg_ref[...]) + yo * bn_scale(yo, og_ref[...])

    se, te = bn_scale_shift(out, eg_ref[...], ebe_ref[...])
    o_ref[...] = jnp.maximum(out * se + te, 0.0).astype(o_ref.dtype)


def init_params(key, in_channels, out_channels, kernel_size, num_layers, divs):
    assert kernel_size % 2 == 1
    assert in_channels > 1
    c0 = in_channels // divs
    ks = jax.random.split(key, 18)

    def w(k, shape, scale=0.3):
        return scale * jax.random.normal(k, shape, jnp.float32)

    return {
        'fconv_w': w(ks[0], (c0, in_channels, 1)),
        'fconv_b': w(ks[1], (c0,), 0.1),
        'fconv_g': 1.0 + w(ks[2], (c0,), 0.1),
        'fconv_be': w(ks[3], (c0,), 0.1),
        'cconv_w': w(ks[4], (out_channels, in_channels, 1)),
        'cconv_b': w(ks[5], (out_channels,), 0.1),
        'cconv_g': 1.0 + w(ks[6], (out_channels,), 0.1),
        'cconv_be': w(ks[7], (out_channels,), 0.1),
        'dconv_w': w(ks[8], (num_layers, c0, c0, kernel_size)),
        'dconv_b': w(ks[9], (num_layers, c0), 0.1),
        'dconv_g': 1.0 + w(ks[10], (num_layers, c0), 0.1),
        'dconv_be': w(ks[11], (num_layers, c0), 0.1),
        'oconv_w': w(ks[12], (out_channels, c0, 1)),
        'oconv_b': w(ks[13], (out_channels,), 0.1),
        'oconv_g': 1.0 + w(ks[14], (out_channels,), 0.1),
        'oconv_be': w(ks[15], (out_channels,), 0.1),
        'end_g': 1.0 + w(ks[16], (out_channels,), 0.1),
        'end_be': w(ks[17], (out_channels,), 0.1),
    }


def dilated_wide_unit(x, params, *, num_layers, kernel_size, dilation_rate):
    n, c_in, length = x.shape
    c_out = params['cconv_w'].shape[0]
    c0 = params['fconv_w'].shape[0]
    nl = n * length
    c0p = -(-c0 // 8) * 8          # pad C0 up to the f32 sublane tile (8)

    dilations = [dilation_rate ** i for i in range(num_layers)]
    pads = [int((kernel_size * d - d) / 2) for d in dilations]

    # Per-layer dense weights (K*C0p, C0p): row-block j = tap `order[j]`, with
    # the zero-shift (center) tap first so block 0 needs no roll/mask.
    layer_shifts = []
    dws = []
    for i in range(num_layers):
        shifts_i = [pads[i] - k * dilations[i] for k in range(kernel_size)]
        assert 0 in shifts_i                    # odd kernel => center tap has shift 0
        k0 = shifts_i.index(0)
        order = [k0] + [k for k in range(kernel_size) if k != k0]
        layer_shifts.append(tuple(shifts_i[k] for k in order))
        wi = jnp.zeros((kernel_size * c0p, c0p), jnp.float32)
        for j, k in enumerate(order):
            wi = wi.at[j * c0p:j * c0p + c0, :c0].set(params['dconv_w'][i, :, :, k])
        dws.append(wi)
    dw = jnp.stack(dws, axis=0).astype(jnp.bfloat16)        # (L, K*C0p, C0p) bf16

    # fconv + cconv stacked into one weight (padded fconv rows stay zero).
    fcw = jnp.zeros((c0p + c_out, c_in), jnp.float32)
    fcw = fcw.at[:c0, :].set(params['fconv_w'][:, :, 0])
    fcw = fcw.at[c0p:, :].set(params['cconv_w'][:, :, 0])
    fcw = fcw.astype(jnp.bfloat16)

    ow = jnp.zeros((c_out, c0p), jnp.float32).at[:, :c0].set(
        params['oconv_w'][:, :, 0]).astype(jnp.bfloat16)

    def col(v):                                  # (C,) -> (C, 1) f32
        return v.reshape(-1, 1).astype(jnp.float32)

    def pad_col(v, rows):                        # (C,) -> (rows, 1), zero pad
        return jnp.zeros((rows, 1), jnp.float32).at[:v.shape[0], 0].set(v)

    fg, fbe = pad_col(params['fconv_g'], c0p), pad_col(params['fconv_be'], c0p)
    dg = jnp.zeros((num_layers, c0p, 1), jnp.float32).at[:, :c0, 0].set(params['dconv_g'])
    dbe = jnp.zeros((num_layers, c0p, 1), jnp.float32).at[:, :c0, 0].set(params['dconv_be'])

    # Fold batch into the lane axis: (N, C, L) -> (C, N*L), lane-dense tiles.
    # (Conv biases and the cconv/oconv BN betas are algebraically eliminated.)
    x_fused = jnp.transpose(x, (1, 0, 2)).reshape(c_in, nl).astype(jnp.bfloat16)
    pos = jnp.tile(jnp.arange(length, dtype=jnp.int32), n).reshape(1, nl)

    args = [
        pos, x_fused,
        fcw, fg, fbe, col(params['cconv_g']),
        dw, dg, dbe,
        ow, col(params['oconv_g']),
        col(params['end_g']), col(params['end_be']),
    ]

    def full_spec(a):
        return pl.BlockSpec(a.shape, lambda i, _n=a.ndim: (0,) * _n)

    kernel = functools.partial(
        _dilated_wide_unit_kernel,
        num_layers=num_layers, c0p=c0p,
        layer_shifts=tuple(layer_shifts), seg_len=length)

    # Per-generation VMEM cap: leave headroom on v7x (64 MiB physical/TC), use
    # more of v5e/v6e's 128 MiB.
    try:
        phys_vmem = int(pltpu.get_tpu_info().vmem_capacity_bytes)
    except Exception:
        phys_vmem = 64 << 20
    vmem_cap = min(int(phys_vmem * 0.85), 110 << 20)

    weight_bytes = sum(int(a.size) * a.dtype.itemsize for a in args)
    live_rows = (c_in + (c0p + c_out) + 3 * c0p
                 + kernel_size * c0p + 3 * c_out)
    work_bytes = 4 * live_rows * nl + weight_bytes
    vmem_limit = int(min(max(4 * work_bytes + (1 << 20), 4 << 20), vmem_cap))

    flops = 2 * nl * ((c0p + c_out) * c_in
                      + num_layers * kernel_size * c0p * c0p
                      + c_out * c0p)
    cost = pl.CostEstimate(
        flops=int(flops),
        transcendentals=int(c0p + num_layers * c0p + 3 * c_out),
        bytes_accessed=int(2 * c_in * nl + 4 * c_out * nl + weight_bytes))

    out_fused = pl.pallas_call(
        kernel,
        out_shape=jax.ShapeDtypeStruct((c_out, nl), x.dtype),
        grid=(1,),
        in_specs=[full_spec(a) for a in args],
        out_specs=pl.BlockSpec((c_out, nl), lambda i: (0, 0)),
        compiler_params=pltpu.CompilerParams(
            dimension_semantics=("arbitrary",),
            vmem_limit_bytes=vmem_limit),
        cost_estimate=cost,
    )(*args)

    # (C_out, N*L) lane-dense slab -> (N, C_out, L)
    return jnp.transpose(out_fused.reshape(c_out, n, length), (1, 0, 2))


def _reference(x, params, *, num_layers, kernel_size, dilation_rate,
               mxu_dtype=jnp.float32):
    """Pure-JAX reference mirroring the PyTorch forward (training-mode BN).

    `mxu_dtype=jnp.bfloat16` applies the same operand casts as the kernel's
    MXU matmuls (f32 accumulation), for a tight mixed-precision comparison.
    """
    dilations = [dilation_rate ** i for i in range(num_layers)]
    pads = [int((kernel_size * d - d) / 2) for d in dilations]

    def cast(a):
        return a.astype(mxu_dtype)

    def conv1x1(v, w, b):
        y = jnp.einsum('oi,nil->nol', cast(w[:, :, 0]), cast(v),
                       preferred_element_type=jnp.float32)
        return y + b[None, :, None]

    def bn(v, g, be):
        m = jnp.mean(v, axis=(0, 2), keepdims=True)
        var = jnp.mean((v - m) ** 2, axis=(0, 2), keepdims=True)
        return (v - m) / jnp.sqrt(var + _EPS) * g[None, :, None] + be[None, :, None]

    def dconv(v, w, b, d, pad):
        length = v.shape[-1]
        vp = jnp.pad(cast(v), ((0, 0), (0, 0), (pad, pad)))
        out = b[None, :, None]
        for k in range(kernel_size):
            out = out + jnp.einsum('oi,nil->nol', cast(w[:, :, k]),
                                   vp[:, :, k * d:k * d + length],
                                   preferred_element_type=jnp.float32)
        return out

    x_fork = bn(conv1x1(x, params['cconv_w'], params['cconv_b']),
                params['cconv_g'], params['cconv_be'])
    x_init = jax.nn.relu(bn(conv1x1(x, params['fconv_w'], params['fconv_b']),
                            params['fconv_g'], params['fconv_be']))
    acc = x_init / num_layers
    for i in range(num_layers):
        y = dconv(x_init, params['dconv_w'][i], params['dconv_b'][i],
                  dilations[i], pads[i])
        y = bn(y, params['dconv_g'][i], params['dconv_be'][i])
        acc = acc + y / num_layers
    acc = jax.nn.relu(acc)
    out = bn(conv1x1(acc, params['oconv_w'], params['oconv_b']),
             params['oconv_g'], params['oconv_be'])
    out = x_fork + out
    out = bn(out, params['end_g'], params['end_be'])
    return jax.nn.relu(out)


if __name__ == "__main__":
    # Small shapes consistent with the module: N=2, in_channels=8, L=16,
    # out_channels=8, kernel_size=3, num_layers=4, dilation_rate=2, divs=2.
    N, C_IN, C_OUT, L = 2, 8, 8, 16
    K, NUM_LAYERS, DIL_RATE, DIVS = 3, 4, 2, 2

    key = jax.random.PRNGKey(0)
    kx, kp = jax.random.split(key)
    x = jax.random.normal(kx, (N, C_IN, L), jnp.float32)
    params = init_params(kp, C_IN, C_OUT, K, NUM_LAYERS, DIVS)

    y = dilated_wide_unit(x, params, num_layers=NUM_LAYERS,
                          kernel_size=K, dilation_rate=DIL_RATE)
    y = jax.block_until_ready(y)
    assert y.shape == (N, C_OUT, L)

    # Tight check vs a reference using the same bf16 MXU operands (f32 accum).
    y_ref_bf = _reference(x, params, num_layers=NUM_LAYERS, kernel_size=K,
                          dilation_rate=DIL_RATE, mxu_dtype=jnp.bfloat16)
    err_bf = float(jnp.max(jnp.abs(y - y_ref_bf)))
    assert jnp.allclose(y, y_ref_bf, atol=3e-3, rtol=3e-3), err_bf

    # Loose sanity check vs the pure-f32 reference (bf16 operand rounding).
    y_ref_f32 = _reference(x, params, num_layers=NUM_LAYERS, kernel_size=K,
                           dilation_rate=DIL_RATE)
    err_f32 = float(jnp.max(jnp.abs(y - y_ref_f32)))
    assert jnp.allclose(y, y_ref_f32, atol=1e-1, rtol=1e-1), err_f32

    print("KERNEL_OK")
</pallas_src>

<mosaic_0001>
module attributes {stable_mosaic.version = 11 : i64} {
  func.func @_dilated_wide_unit_kernel(%arg0: i32, %arg1: memref<1x32xi32, #tpu.memory_space<vmem>>, %arg2: memref<8x32xbf16, #tpu.memory_space<vmem>>, %arg3: memref<16x8xbf16, #tpu.memory_space<vmem>>, %arg4: memref<8x1xf32, #tpu.memory_space<vmem>>, %arg5: memref<8x1xf32, #tpu.memory_space<vmem>>, %arg6: memref<8x1xf32, #tpu.memory_space<vmem>>, %arg7: memref<4x24x8xbf16, #tpu.memory_space<vmem>>, %arg8: memref<4x8x1xf32, #tpu.memory_space<vmem>>, %arg9: memref<4x8x1xf32, #tpu.memory_space<vmem>>, %arg10: memref<8x8xbf16, #tpu.memory_space<vmem>>, %arg11: memref<8x1xf32, #tpu.memory_space<vmem>>, %arg12: memref<8x1xf32, #tpu.memory_space<vmem>>, %arg13: memref<8x1xf32, #tpu.memory_space<vmem>>, %arg14: memref<8x32xf32, #tpu.memory_space<vmem>>) attributes {dimension_semantics = [#tpu.dimension_semantics<arbitrary>], iteration_bounds = array<i64: 1>, scalar_prefetch = 0 : i64, scratch_operands = 0 : i64, tpu.core_type = #tpu.core_type<tc>, window_params = [{pipeline_mode = #tpu.pipeline_mode<synchronous>, transform_indices = @transform_0, window_bounds = array<i64: 1, 32>}, {pipeline_mode = #tpu.pipeline_mode<synchronous>, transform_indices = @transform_1, window_bounds = array<i64: 8, 32>}, {pipeline_mode = #tpu.pipeline_mode<synchronous>, transform_indices = @transform_2, window_bounds = array<i64: 16, 8>}, {pipeline_mode = #tpu.pipeline_mode<synchronous>, transform_indices = @transform_3, window_bounds = array<i64: 8, 1>}, {pipeline_mode = #tpu.pipeline_mode<synchronous>, transform_indices = @transform_4, window_bounds = array<i64: 8, 1>}, {pipeline_mode = #tpu.pipeline_mode<synchronous>, transform_indices = @transform_5, window_bounds = array<i64: 8, 1>}, {pipeline_mode = #tpu.pipeline_mode<synchronous>, transform_indices = @transform_6, window_bounds = array<i64: 4, 24, 8>}, {pipeline_mode = #tpu.pipeline_mode<synchronous>, transform_indices = @transform_7, window_bounds = array<i64: 4, 8, 1>}, {pipeline_mode = #tpu.pipeline_mode<synchronous>, transform_indices = @transform_8, window_bounds = array<i64: 4, 8, 1>}, {pipeline_mode = #tpu.pipeline_mode<synchronous>, transform_indices = @transform_9, window_bounds = array<i64: 8, 8>}, {pipeline_mode = #tpu.pipeline_mode<synchronous>, transform_indices = @transform_10, window_bounds = array<i64: 8, 1>}, {pipeline_mode = #tpu.pipeline_mode<synchronous>, transform_indices = @transform_11, window_bounds = array<i64: 8, 1>}, {pipeline_mode = #tpu.pipeline_mode<synchronous>, transform_indices = @transform_12, window_bounds = array<i64: 8, 1>}, {pipeline_mode = #tpu.pipeline_mode<synchronous>, transform_indices = @transform_13, window_bounds = array<i64: 8, 32>}]} {
    %c0 = arith.constant 0 : index
    %c0_0 = arith.constant 0 : index
    %0 = vector.load %arg1[%c0, %c0_0] : memref<1x32xi32, #tpu.memory_space<vmem>>, vector<1x32xi32>
    %c0_1 = arith.constant 0 : index
    %c0_2 = arith.constant 0 : index
    %1 = vector.load %arg3[%c0_1, %c0_2] : memref<16x8xbf16, #tpu.memory_space<vmem>>, vector<16x8xbf16>
    %c0_3 = arith.constant 0 : index
    %c0_4 = arith.constant 0 : index
    %2 = vector.load %arg2[%c0_3, %c0_4] : memref<8x32xbf16, #tpu.memory_space<vmem>>, vector<8x32xbf16>
    %cst = arith.constant dense<0.000000e+00> : vector<16x32xf32>
    %3 = tpu.matmul %1, %2, %cst {dimension_numbers = #tpu.dot_dimension_numbers<[1], [0], [0], [1], [0, 0, 1, 1], [], []>} : vector<16x8xbf16>, vector<8x32xbf16>, vector<16x32xf32> -> vector<16x32xf32>
    %4 = vector.extract_strided_slice %3 {offsets = [0, 0], sizes = [8, 32], strides = [1, 1]} : vector<16x32xf32> to vector<8x32xf32>
    %5 = vector.extract_strided_slice %3 {offsets = [8, 0], sizes = [8, 32], strides = [1, 1]} : vector<16x32xf32> to vector<8x32xf32>
    %c0_5 = arith.constant 0 : index
    %c0_6 = arith.constant 0 : index
    %6 = vector.load %arg4[%c0_5, %c0_6] : memref<8x1xf32, #tpu.memory_space<vmem>>, vector<8x1xf32>
    %c0_7 = arith.constant 0 : index
    %c0_8 = arith.constant 0 : index
    %7 = vector.load %arg5[%c0_7, %c0_8] : memref<8x1xf32, #tpu.memory_space<vmem>>, vector<8x1xf32>
    %cst_9 = arith.constant dense<0.000000e+00> : vector<8xf32>
    %8 = vector.multi_reduction <add>, %4, %cst_9 [1] : vector<8x32xf32> to vector<8xf32>
    %9 = vector.shape_cast %8 : vector<8xf32> to vector<8x1xf32>
    %cst_10 = arith.constant 3.125000e-02 : f32
    %10 = vector.broadcast %cst_10 : f32 to vector<8x1xf32>
    %11 = arith.mulf %9, %10 : vector<8x1xf32>
    %12 = arith.mulf %4, %4 : vector<8x32xf32>
    %cst_11 = arith.constant dense<0.000000e+00> : vector<8xf32>
    %13 = vector.multi_reduction <add>, %12, %cst_11 [1] : vector<8x32xf32> to vector<8xf32>
    %14 = vector.shape_cast %13 : vector<8xf32> to vector<8x1xf32>
    %cst_12 = arith.constant 3.125000e-02 : f32
    %15 = vector.broadcast %cst_12 : f32 to vector<8x1xf32>
    %16 = arith.mulf %14, %15 : vector<8x1xf32>
    %17 = arith.mulf %11, %11 : vector<8x1xf32>
    %18 = arith.subf %16, %17 : vector<8x1xf32>
    %cst_13 = arith.constant 9.99999974E-6 : f32
    %19 = vector.broadcast %cst_13 : f32 to vector<8x1xf32>
    %20 = arith.addf %18, %19 : vector<8x1xf32>
    %21 = math.rsqrt %20 : vector<8x1xf32>
    %22 = arith.mulf %6, %21 : vector<8x1xf32>
    %23 = arith.mulf %11, %22 : vector<8x1xf32>
    %24 = arith.subf %7, %23 : vector<8x1xf32>
    %25 = vector.broadcast %22 : vector<8x1xf32> to vector<8x32xf32>
    %26 = arith.mulf %4, %25 : vector<8x32xf32>
    %27 = vector.broadcast %24 : vector<8x1xf32> to vector<8x32xf32>
    %28 = arith.addf %26, %27 : vector<8x32xf32>
    %cst_14 = arith.constant 0.000000e+00 : f32
    %29 = vector.broadcast %cst_14 : f32 to vector<8x32xf32>
    %30 = arith.maximumf %28, %29 : vector<8x32xf32>
    %31 = arith.truncf %30 : vector<8x32xf32> to vector<8x32xbf16>
    %c0_15 = arith.constant 0 : index
    %c0_16 = arith.constant 0 : index
    %c0_17 = arith.constant 0 : index
    %32 = vector.load %arg7[%c0_15, %c0_16, %c0_17] : memref<4x24x8xbf16, #tpu.memory_space<vmem>>, vector<1x24x8xbf16>
    %33 = vector.shape_cast %32 : vector<1x24x8xbf16> to vector<24x8xbf16>
    %cst_18 = arith.constant dense<0.000000e+00> : vector<24x32xf32>
    %34 = tpu.matmul %33, %31, %cst_18 {dimension_numbers = #tpu.dot_dimension_numbers<[1], [0], [0], [1], [0, 0, 1, 1], [], []>} : vector<24x8xbf16>, vector<8x32xbf16>, vector<24x32xf32> -> vector<24x32xf32>
    %35 = vector.extract_strided_slice %34 {offsets = [0, 0], sizes = [8, 32], strides = [1, 1]} : vector<24x32xf32> to vector<8x32xf32>
    %36 = vector.extract_strided_slice %34 {offsets = [8, 0], sizes = [8, 32], strides = [1, 1]} : vector<24x32xf32> to vector<8x32xf32>
    %c1_i32 = arith.constant 1 : i32
    %37 = tpu.dynamic_rotate %36 by %c1_i32 dim 1 : vector<8x32xf32>, i32 -> vector<8x32xf32>
    %c1_i32_19 = arith.constant 1 : i32
    %38 = vector.broadcast %c1_i32_19 : i32 to vector<1x32xi32>
    %39 = arith.cmpi sge, %0, %38 : vector<1x32xi32>
    %cst_20 = arith.constant 0.000000e+00 : f32
    %40 = vector.shape_cast %39 : vector<1x32xi1> to vector<1x32xi1>
    %41 = vector.broadcast %40 : vector<1x32xi1> to vector<8x32xi1>
    %42 = vector.broadcast %cst_20 : f32 to vector<8x32xf32>
    %43 = arith.select %41, %37, %42 : vector<8x32xi1>, vector<8x32xf32>
    %44 = arith.addf %35, %43 : vector<8x32xf32>
    %45 = vector.extract_strided_slice %34 {offsets = [16, 0], sizes = [8, 32], strides = [1, 1]} : vector<24x32xf32> to vector<8x32xf32>
    %c31_i32 = arith.constant 31 : i32
    %46 = tpu.dynamic_rotate %45 by %c31_i32 dim 1 : vector<8x32xf32>, i32 -> vector<8x32xf32>
    %c15_i32 = arith.constant 15 : i32
    %47 = vector.broadcast %c15_i32 : i32 to vector<1x32xi32>
    %48 = arith.cmpi slt, %0, %47 : vector<1x32xi32>
    %cst_21 = arith.constant 0.000000e+00 : f32
    %49 = vector.shape_cast %48 : vector<1x32xi1> to vector<1x32xi1>
    %50 = vector.broadcast %49 : vector<1x32xi1> to vector<8x32xi1>
    %51 = vector.broadcast %cst_21 : f32 to vector<8x32xf32>
    %52 = arith.select %50, %46, %51 : vector<8x32xi1>, vector<8x32xf32>
    %53 = arith.addf %44, %52 : vector<8x32xf32>
    %c0_22 = arith.constant 0 : index
    %c0_23 = arith.constant 0 : index
    %c0_24 = arith.constant 0 : index
    %54 = vector.load %arg8[%c0_22, %c0_23, %c0_24] : memref<4x8x1xf32, #tpu.memory_space<vmem>>, vector<1x8x1xf32>
    %55 = vector.shape_cast %54 : vector<1x8x1xf32> to vector<8x1xf32>
    %c0_25 = arith.constant 0 : index
    %c0_26 = arith.constant 0 : index
    %c0_27 = arith.constant 0 : index
    %56 = vector.load %arg9[%c0_25, %c0_26, %c0_27] : memref<4x8x1xf32, #tpu.memory_space<vmem>>, vector<1x8x1xf32>
    %57 = vector.shape_cast %56 : vector<1x8x1xf32> to vector<8x1xf32>
    %cst_28 = arith.constant dense<0.000000e+00> : vector<8xf32>
    %58 = vector.multi_reduction <add>, %53, %cst_28 [1] : vector<8x32xf32> to vector<8xf32>
    %59 = vector.shape_cast %58 : vector<8xf32> to vector<8x1xf32>
    %cst_29 = arith.constant 3.125000e-02 : f32
    %60 = vector.broadcast %cst_29 : f32 to vector<8x1xf32>
    %61 = arith.mulf %59, %60 : vector<8x1xf32>
    %62 = arith.mulf %53, %53 : vector<8x32xf32>
    %cst_30 = arith.constant dense<0.000000e+00> : vector<8xf32>
    %63 = vector.multi_reduction <add>, %62, %cst_30 [1] : vector<8x32xf32> to vector<8xf32>
    %64 = vector.shape_cast %63 : vector<8xf32> to vector<8x1xf32>
    %cst_31 = arith.constant 3.125000e-02 : f32
    %65 = vector.broadcast %cst_31 : f32 to vector<8x1xf32>
    %66 = arith.mulf %64, %65 : vector<8x1xf32>
    %67 = arith.mulf %61, %61 : vector<8x1xf32>
    %68 = arith.subf %66, %67 : vector<8x1xf32>
    %cst_32 = arith.constant 9.99999974E-6 : f32
    %69 = vector.broadcast %cst_32 : f32 to vector<8x1xf32>
    %70 = arith.addf %68, %69 : vector<8x1xf32>
    %71 = math.rsqrt %70 : vector<8x1xf32>
    %72 = arith.mulf %55, %71 : vector<8x1xf32>
    %73 = arith.mulf %61, %72 : vector<8x1xf32>
    %74 = arith.subf %57, %73 : vector<8x1xf32>
    %75 = vector.broadcast %72 : vector<8x1xf32> to vector<8x32xf32>
    %76 = arith.mulf %53, %75 : vector<8x32xf32>
    %77 = vector.broadcast %74 : vector<8x1xf32> to vector<8x32xf32>
    %78 = arith.addf %76, %77 : vector<8x32xf32>
    %79 = arith.addf %30, %78 : vector<8x32xf32>
    %c1 = arith.constant 1 : index
    %c0_33 = arith.constant 0 : index
    %c0_34 = arith.constant 0 : index
    %80 = vector.load %arg7[%c1, %c0_33, %c0_34] : memref<4x24x8xbf16, #tpu.memory_space<vmem>>, vector<1x24x8xbf16>
    %81 = vector.shape_cast %80 : vector<1x24x8xbf16> to vector<24x8xbf16>
    %cst_35 = arith.constant dense<0.000000e+00> : vector<24x32xf32>
    %82 = tpu.matmul %81, %31, %cst_35 {dimension_numbers = #tpu.dot_dimension_numbers<[1], [0], [0], [1], [0, 0, 1, 1], [], []>} : vector<24x8xbf16>, vector<8x32xbf16>, vector<24x32xf32> -> vector<24x32xf32>
    %83 = vector.extract_strided_slice %82 {offsets = [0, 0], sizes = [8, 32], strides = [1, 1]} : vector<24x32xf32> to vector<8x32xf32>
    %84 = vector.extract_strided_slice %82 {offsets = [8, 0], sizes = [8, 32], strides = [1, 1]} : vector<24x32xf32> to vector<8x32xf32>
    %c2_i32 = arith.constant 2 : i32
    %85 = tpu.dynamic_rotate %84 by %c2_i32 dim 1 : vector<8x32xf32>, i32 -> vector<8x32xf32>
    %c2_i32_36 = arith.constant 2 : i32
    %86 = vector.broadcast %c2_i32_36 : i32 to vector<1x32xi32>
    %87 = arith.cmpi sge, %0, %86 : vector<1x32xi32>
    %cst_37 = arith.constant 0.000000e+00 : f32
    %88 = vector.shape_cast %87 : vector<1x32xi1> to vector<1x32xi1>
    %89 = vector.broadcast %88 : vector<1x32xi1> to vector<8x32xi1>
    %90 = vector.broadcast %cst_37 : f32 to vector<8x32xf32>
    %91 = arith.select %89, %85, %90 : vector<8x32xi1>, vector<8x32xf32>
    %92 = arith.addf %83, %91 : vector<8x32xf32>
    %93 = vector.extract_strided_slice %82 {offsets = [16, 0], sizes = [8, 32], strides = [1, 1]} : vector<24x32xf32> to vector<8x32xf32>
    %c30_i32 = arith.constant 30 : i32
    %94 = tpu.dynamic_rotate %93 by %c30_i32 dim 1 : vector<8x32xf32>, i32 -> vector<8x32xf32>
    %c14_i32 = arith.constant 14 : i32
    %95 = vector.broadcast %c14_i32 : i32 to vector<1x32xi32>
    %96 = arith.cmpi slt, %0, %95 : vector<1x32xi32>
    %cst_38 = arith.constant 0.000000e+00 : f32
    %97 = vector.shape_cast %96 : vector<1x32xi1> to vector<1x32xi1>
    %98 = vector.broadcast %97 : vector<1x32xi1> to vector<8x32xi1>
    %99 = vector.broadcast %cst_38 : f32 to vector<8x32xf32>
    %100 = arith.select %98, %94, %99 : vector<8x32xi1>, vector<8x32xf32>
    %101 = arith.addf %92, %100 : vector<8x32xf32>
    %c1_39 = arith.constant 1 : index
    %c0_40 = arith.constant 0 : index
    %c0_41 = arith.constant 0 : index
    %102 = vector.load %arg8[%c1_39, %c0_40, %c0_41] : memref<4x8x1xf32, #tpu.memory_space<vmem>>, vector<1x8x1xf32>
    %103 = vector.shape_cast %102 : vector<1x8x1xf32> to vector<8x1xf32>
    %c1_42 = arith.constant 1 : index
    %c0_43 = arith.constant 0 : index
    %c0_44 = arith.constant 0 : index
    %104 = vector.load %arg9[%c1_42, %c0_43, %c0_44] : memref<4x8x1xf32, #tpu.memory_space<vmem>>, vector<1x8x1xf32>
    %105 = vector.shape_cast %104 : vector<1x8x1xf32> to vector<8x1xf32>
    %cst_45 = arith.constant dense<0.000000e+00> : vector<8xf32>
    %106 = vector.multi_reduction <add>, %101, %cst_45 [1] : vector<8x32xf32> to vector<8xf32>
    %107 = vector.shape_cast %106 : vector<8xf32> to vector<8x1xf32>
    %cst_46 = arith.constant 3.125000e-02 : f32
    %108 = vector.broadcast %cst_46 : f32 to vector<8x1xf32>
    %109 = arith.mulf %107, %108 : vector<8x1xf32>
    %110 = arith.mulf %101, %101 : vector<8x32xf32>
    %cst_47 = arith.constant dense<0.000000e+00> : vector<8xf32>
    %111 = vector.multi_reduction <add>, %110, %cst_47 [1] : vector<8x32xf32> to vector<8xf32>
    %112 = vector.shape_cast %111 : vector<8xf32> to vector<8x1xf32>
    %cst_48 = arith.constant 3.125000e-02 : f32
    %113 = vector.broadcast %cst_48 : f32 to vector<8x1xf32>
    %114 = arith.mulf %112, %113 : vector<8x1xf32>
    %115 = arith.mulf %109, %109 : vector<8x1xf32>
    %116 = arith.subf %114, %115 : vector<8x1xf32>
    %cst_49 = arith.constant 9.99999974E-6 : f32
    %117 = vector.broadcast %cst_49 : f32 to vector<8x1xf32>
    %118 = arith.addf %116, %117 : vector<8x1xf32>
    %119 = math.rsqrt %118 : vector<8x1xf32>
    %120 = arith.mulf %103, %119 : vector<8x1xf32>
    %121 = arith.mulf %109, %120 : vector<8x1xf32>
    %122 = arith.subf %105, %121 : vector<8x1xf32>
    %123 = vector.broadcast %120 : vector<8x1xf32> to vector<8x32xf32>
    %124 = arith.mulf %101, %123 : vector<8x32xf32>
    %125 = vector.broadcast %122 : vector<8x1xf32> to vector<8x32xf32>
    %126 = arith.addf %124, %125 : vector<8x32xf32>
    %127 = arith.addf %79, %126 : vector<8x32xf32>
    %c2 = arith.constant 2 : index
    %c0_50 = arith.constant 0 : index
    %c0_51 = arith.constant 0 : index
    %128 = vector.load %arg7[%c2, %c0_50, %c0_51] : memref<4x24x8xbf16, #tpu.memory_space<vmem>>, vector<1x24x8xbf16>
    %129 = vector.shape_cast %128 : vector<1x24x8xbf16> to vector<24x8xbf16>
    %cst_52 = arith.constant dense<0.000000e+00> : vector<24x32xf32>
    %130 = tpu.matmul %129, %31, %cst_52 {dimension_numbers = #tpu.dot_dimension_numbers<[1], [0], [0], [1], [0, 0, 1, 1], [], []>} : vector<24x8xbf16>, vector<8x32xbf16>, vector<24x32xf32> -> vector<24x32xf32>
    %131 = vector.extract_strided_slice %130 {offsets = [0, 0], sizes = [8, 32], strides = [1, 1]} : vector<24x32xf32> to vector<8x32xf32>
    %132 = vector.extract_strided_slice %130 {offsets = [8, 0], sizes = [8, 32], strides = [1, 1]} : vector<24x32xf32> to vector<8x32xf32>
    %c4_i32 = arith.constant 4 : i32
    %133 = tpu.dynamic_rotate %132 by %c4_i32 dim 1 : vector<8x32xf32>, i32 -> vector<8x32xf32>
    %c4_i32_53 = arith.constant 4 : i32
    %134 = vector.broadcast %c4_i32_53 : i32 to vector<1x32xi32>
    %135 = arith.cmpi sge, %0, %134 : vector<1x32xi32>
    %cst_54 = arith.constant 0.000000e+00 : f32
    %136 = vector.shape_cast %135 : vector<1x32xi1> to vector<1x32xi1>
    %137 = vector.broadcast %136 : vector<1x32xi1> to vector<8x32xi1>
    %138 = vector.broadcast %cst_54 : f32 to vector<8x32xf32>
    %139 = arith.select %137, %133, %138 : vector<8x32xi1>, vector<8x32xf32>
    %140 = arith.addf %131, %139 : vector<8x32xf32>
    %141 = vector.extract_strided_slice %130 {offsets = [16, 0], sizes = [8, 32], strides = [1, 1]} : vector<24x32xf32> to vector<8x32xf32>
    %c28_i32 = arith.constant 28 : i32
    %142 = tpu.dynamic_rotate %141 by %c28_i32 dim 1 : vector<8x32xf32>, i32 -> vector<8x32xf32>
    %c12_i32 = arith.constant 12 : i32
    %143 = vector.broadcast %c12_i32 : i32 to vector<1x32xi32>
    %144 = arith.cmpi slt, %0, %143 : vector<1x32xi32>
    %cst_55 = arith.constant 0.000000e+00 : f32
    %145 = vector.shape_cast %144 : vector<1x32xi1> to vector<1x32xi1>
    %146 = vector.broadcast %145 : vector<1x32xi1> to vector<8x32xi1>
    %147 = vector.broadcast %cst_55 : f32 to vector<8x32xf32>
    %148 = arith.select %146, %142, %147 : vector<8x32xi1>, vector<8x32xf32>
    %149 = arith.addf %140, %148 : vector<8x32xf32>
    %c2_56 = arith.constant 2 : index
    %c0_57 = arith.constant 0 : index
    %c0_58 = arith.constant 0 : index
    %150 = vector.load %arg8[%c2_56, %c0_57, %c0_58] : memref<4x8x1xf32, #tpu.memory_space<vmem>>, vector<1x8x1xf32>
    %151 = vector.shape_cast %150 : vector<1x8x1xf32> to vector<8x1xf32>
    %c2_59 = arith.constant 2 : index
    %c0_60 = arith.constant 0 : index
    %c0_61 = arith.constant 0 : index
    %152 = vector.load %arg9[%c2_59, %c0_60, %c0_61] : memref<4x8x1xf32, #tpu.memory_space<vmem>>, vector<1x8x1xf32>
    %153 = vector.shape_cast %152 : vector<1x8x1xf32> to vector<8x1xf32>
    %cst_62 = arith.constant dense<0.000000e+00> : vector<8xf32>
    %154 = vector.multi_reduction <add>, %149, %cst_62 [1] : vector<8x32xf32> to vector<8xf32>
    %155 = vector.shape_cast %154 : vector<8xf32> to vector<8x1xf32>
    %cst_63 = arith.constant 3.125000e-02 : f32
    %156 = vector.broadcast %cst_63 : f32 to vector<8x1xf32>
    %157 = arith.mulf %155, %156 : vector<8x1xf32>
    %158 = arith.mulf %149, %149 : vector<8x32xf32>
    %cst_64 = arith.constant dense<0.000000e+00> : vector<8xf32>
    %159 = vector.multi_reduction <add>, %158, %cst_64 [1] : vector<8x32xf32> to vector<8xf32>
    %160 = vector.shape_cast %159 : vector<8xf32> to vector<8x1xf32>
    %cst_65 = arith.constant 3.125000e-02 : f32
    %161 = vector.broadcast %cst_65 : f32 to vector<8x1xf32>
    %162 = arith.mulf %160, %161 : vector<8x1xf32>
    %163 = arith.mulf %157, %157 : vector<8x1xf32>
    %164 = arith.subf %162, %163 : vector<8x1xf32>
    %cst_66 = arith.constant 9.99999974E-6 : f32
    %165 = vector.broadcast %cst_66 : f32 to vector<8x1xf32>
    %166 = arith.addf %164, %165 : vector<8x1xf32>
    %167 = math.rsqrt %166 : vector<8x1xf32>
    %168 = arith.mulf %151, %167 : vector<8x1xf32>
    %169 = arith.mulf %157, %168 : vector<8x1xf32>
    %170 = arith.subf %153, %169 : vector<8x1xf32>
    %171 = vector.broadcast %168 : vector<8x1xf32> to vector<8x32xf32>
    %172 = arith.mulf %149, %171 : vector<8x32xf32>
    %173 = vector.broadcast %170 : vector<8x1xf32> to vector<8x32xf32>
    %174 = arith.addf %172, %173 : vector<8x32xf32>
    %175 = arith.addf %127, %174 : vector<8x32xf32>
    %c3 = arith.constant 3 : index
    %c0_67 = arith.constant 0 : index
    %c0_68 = arith.constant 0 : index
    %176 = vector.load %arg7[%c3, %c0_67, %c0_68] : memref<4x24x8xbf16, #tpu.memory_space<vmem>>, vector<1x24x8xbf16>
    %177 = vector.shape_cast %176 : vector<1x24x8xbf16> to vector<24x8xbf16>
    %cst_69 = arith.constant dense<0.000000e+00> : vector<24x32xf32>
    %178 = tpu.matmul %177, %31, %cst_69 {dimension_numbers = #tpu.dot_dimension_numbers<[1], [0], [0], [1], [0, 0, 1, 1], [], []>} : vector<24x8xbf16>, vector<8x32xbf16>, vector<24x32xf32> -> vector<24x32xf32>
    %179 = vector.extract_strided_slice %178 {offsets = [0, 0], sizes = [8, 32], strides = [1, 1]} : vector<24x32xf32> to vector<8x32xf32>
    %180 = vector.extract_strided_slice %178 {offsets = [8, 0], sizes = [8, 32], strides = [1, 1]} : vector<24x32xf32> to vector<8x32xf32>
    %c8_i32 = arith.constant 8 : i32
    %181 = tpu.dynamic_rotate %180 by %c8_i32 dim 1 : vector<8x32xf32>, i32 -> vector<8x32xf32>
    %c8_i32_70 = arith.constant 8 : i32
    %182 = vector.broadcast %c8_i32_70 : i32 to vector<1x32xi32>
    %183 = arith.cmpi sge, %0, %182 : vector<1x32xi32>
    %cst_71 = arith.constant 0.000000e+00 : f32
    %184 = vector.shape_cast %183 : vector<1x32xi1> to vector<1x32xi1>
    %185 = vector.broadcast %184 : vector<1x32xi1> to vector<8x32xi1>
    %186 = vector.broadcast %cst_71 : f32 to vector<8x32xf32>
    %187 = arith.select %185, %181, %186 : vector<8x32xi1>, vector<8x32xf32>
    %188 = arith.addf %179, %187 : vector<8x32xf32>
    %189 = vector.extract_strided_slice %178 {offsets = [16, 0], sizes = [8, 32], strides = [1, 1]} : vector<24x32xf32> to vector<8x32xf32>
    %c24_i32 = arith.constant 24 : i32
    %190 = tpu.dynamic_rotate %189 by %c24_i32 dim 1 : vector<8x32xf32>, i32 -> vector<8x32xf32>
    %c8_i32_72 = arith.constant 8 : i32
    %191 = vector.broadcast %c8_i32_72 : i32 to vector<1x32xi32>
    %192 = arith.cmpi slt, %0, %191 : vector<1x32xi32>
    %cst_73 = arith.constant 0.000000e+00 : f32
    %193 = vector.shape_cast %192 : vector<1x32xi1> to vector<1x32xi1>
    %194 = vector.broadcast %193 : vector<1x32xi1> to vector<8x32xi1>
    %195 = vector.broadcast %cst_73 : f32 to vector<8x32xf32>
    %196 = arith.select %194, %190, %195 : vector<8x32xi1>, vector<8x32xf32>
    %197 = arith.addf %188, %196 : vector<8x32xf32>
    %c3_74 = arith.constant 3 : index
    %c0_75 = arith.constant 0 : index
    %c0_76 = arith.constant 0 : index
    %198 = vector.load %arg8[%c3_74, %c0_75, %c0_76] : memref<4x8x1xf32, #tpu.memory_space<vmem>>, vector<1x8x1xf32>
    %199 = vector.shape_cast %198 : vector<1x8x1xf32> to vector<8x1xf32>
    %c3_77 = arith.constant 3 : index
    %c0_78 = arith.constant 0 : index
    %c0_79 = arith.constant 0 : index
    %200 = vector.load %arg9[%c3_77, %c0_78, %c0_79] : memref<4x8x1xf32, #tpu.memory_space<vmem>>, vector<1x8x1xf32>
    %201 = vector.shape_cast %200 : vector<1x8x1xf32> to vector<8x1xf32>
    %cst_80 = arith.constant dense<0.000000e+00> : vector<8xf32>
    %202 = vector.multi_reduction <add>, %197, %cst_80 [1] : vector<8x32xf32> to vector<8xf32>
    %203 = vector.shape_cast %202 : vector<8xf32> to vector<8x1xf32>
    %cst_81 = arith.constant 3.125000e-02 : f32
    %204 = vector.broadcast %cst_81 : f32 to vector<8x1xf32>
    %205 = arith.mulf %203, %204 : vector<8x1xf32>
    %206 = arith.mulf %197, %197 : vector<8x32xf32>
    %cst_82 = arith.constant dense<0.000000e+00> : vector<8xf32>
    %207 = vector.multi_reduction <add>, %206, %cst_82 [1] : vector<8x32xf32> to vector<8xf32>
    %208 = vector.shape_cast %207 : vector<8xf32> to vector<8x1xf32>
    %cst_83 = arith.constant 3.125000e-02 : f32
    %209 = vector.broadcast %cst_83 : f32 to vector<8x1xf32>
    %210 = arith.mulf %208, %209 : vector<8x1xf32>
    %211 = arith.mulf %205, %205 : vector<8x1xf32>
    %212 = arith.subf %210, %211 : vector<8x1xf32>
    %cst_84 = arith.constant 9.99999974E-6 : f32
    %213 = vector.broadcast %cst_84 : f32 to vector<8x1xf32>
    %214 = arith.addf %212, %213 : vector<8x1xf32>
    %215 = math.rsqrt %214 : vector<8x1xf32>
    %216 = arith.mulf %199, %215 : vector<8x1xf32>
    %217 = arith.mulf %205, %216 : vector<8x1xf32>
    %218 = arith.subf %201, %217 : vector<8x1xf32>
    %219 = vector.broadcast %216 : vector<8x1xf32> to vector<8x32xf32>
    %220 = arith.mulf %197, %219 : vector<8x32xf32>
    %221 = vector.broadcast %218 : vector<8x1xf32> to vector<8x32xf32>
    %222 = arith.addf %220, %221 : vector<8x32xf32>
    %223 = arith.addf %175, %222 : vector<8x32xf32>
    %cst_85 = arith.constant 2.500000e-01 : f32
    %224 = vector.broadcast %cst_85 : f32 to vector<8x32xf32>
    %225 = arith.mulf %223, %224 : vector<8x32xf32>
    %cst_86 = arith.constant 0.000000e+00 : f32
    %226 = vector.broadcast %cst_86 : f32 to vector<8x32xf32>
    %227 = arith.maximumf %225, %226 : vector<8x32xf32>
    %c0_87 = arith.constant 0 : index
    %c0_88 = arith.constant 0 : index
    %228 = vector.load %arg10[%c0_87, %c0_88] : memref<8x8xbf16, #tpu.memory_space<vmem>>, vector<8x8xbf16>
    %229 = arith.truncf %227 : vector<8x32xf32> to vector<8x32xbf16>
    %cst_89 = arith.constant dense<0.000000e+00> : vector<8x32xf32>
    %230 = tpu.matmul %228, %229, %cst_89 {dimension_numbers = #tpu.dot_dimension_numbers<[1], [0], [0], [1], [0, 0, 1, 1], [], []>} : vector<8x8xbf16>, vector<8x32xbf16>, vector<8x32xf32> -> vector<8x32xf32>
    %c0_90 = arith.constant 0 : index
    %c0_91 = arith.constant 0 : index
    %231 = vector.load %arg6[%c0_90, %c0_91] : memref<8x1xf32, #tpu.memory_space<vmem>>, vector<8x1xf32>
    %cst_92 = arith.constant dense<0.000000e+00> : vector<8xf32>
    %232 = vector.multi_reduction <add>, %5, %cst_92 [1] : vector<8x32xf32> to vector<8xf32>
    %233 = vector.shape_cast %232 : vector<8xf32> to vector<8x1xf32>
    %cst_93 = arith.constant 3.125000e-02 : f32
    %234 = vector.broadcast %cst_93 : f32 to vector<8x1xf32>
    %235 = arith.mulf %233, %234 : vector<8x1xf32>
    %236 = arith.mulf %5, %5 : vector<8x32xf32>
    %cst_94 = arith.constant dense<0.000000e+00> : vector<8xf32>
    %237 = vector.multi_reduction <add>, %236, %cst_94 [1] : vector<8x32xf32> to vector<8xf32>
    %238 = vector.shape_cast %237 : vector<8xf32> to vector<8x1xf32>
    %cst_95 = arith.constant 3.125000e-02 : f32
    %239 = vector.broadcast %cst_95 : f32 to vector<8x1xf32>
    %240 = arith.mulf %238, %239 : vector<8x1xf32>
    %241 = arith.mulf %235, %235 : vector<8x1xf32>
    %242 = arith.subf %240, %241 : vector<8x1xf32>
    %cst_96 = arith.constant 9.99999974E-6 : f32
    %243 = vector.broadcast %cst_96 : f32 to vector<8x1xf32>
    %244 = arith.addf %242, %243 : vector<8x1xf32>
    %245 = math.rsqrt %244 : vector<8x1xf32>
    %246 = arith.mulf %231, %245 : vector<8x1xf32>
    %247 = vector.broadcast %246 : vector<8x1xf32> to vector<8x32xf32>
    %248 = arith.mulf %5, %247 : vector<8x32xf32>
    %c0_97 = arith.constant 0 : index
    %c0_98 = arith.constant 0 : index
    %249 = vector.load %arg11[%c0_97, %c0_98] : memref<8x1xf32, #tpu.memory_space<vmem>>, vector<8x1xf32>
    %cst_99 = arith.constant dense<0.000000e+00> : vector<8xf32>
    %250 = vector.multi_reduction <add>, %230, %cst_99 [1] : vector<8x32xf32> to vector<8xf32>
    %251 = vector.shape_cast %250 : vector<8xf32> to vector<8x1xf32>
    %cst_100 = arith.constant 3.125000e-02 : f32
    %252 = vector.broadcast %cst_100 : f32 to vector<8x1xf32>
    %253 = arith.mulf %251, %252 : vector<8x1xf32>
    %254 = arith.mulf %230, %230 : vector<8x32xf32>
    %cst_101 = arith.constant dense<0.000000e+00> : vector<8xf32>
    %255 = vector.multi_reduction <add>, %254, %cst_101 [1] : vector<8x32xf32> to vector<8xf32>
    %256 = vector.shape_cast %255 : vector<8xf32> to vector<8x1xf32>
    %cst_102 = arith.constant 3.125000e-02 : f32
    %257 = vector.broadcast %cst_102 : f32 to vector<8x1xf32>
    %258 = arith.mulf %256, %257 : vector<8x1xf32>
    %259 = arith.mulf %253, %253 : vector<8x1xf32>
    %260 = arith.subf %258, %259 : vector<8x1xf32>
    %cst_103 = arith.constant 9.99999974E-6 : f32
    %261 = vector.broadcast %cst_103 : f32 to vector<8x1xf32>
    %262 = arith.addf %260, %261 : vector<8x1xf32>
    %263 = math.rsqrt %262 : vector<8x1xf32>
    %264 = arith.mulf %249, %263 : vector<8x1xf32>
    %265 = vector.broadcast %264 : vector<8x1xf32> to vector<8x32xf32>
    %266 = arith.mulf %230, %265 : vector<8x32xf32>
    %267 = arith.addf %248, %266 : vector<8x32xf32>
    %c0_104 = arith.constant 0 : index
    %c0_105 = arith.constant 0 : index
    %268 = vector.load %arg12[%c0_104, %c0_105] : memref<8x1xf32, #tpu.memory_space<vmem>>, vector<8x1xf32>
    %c0_106 = arith.constant 0 : index
    %c0_107 = arith.constant 0 : index
    %269 = vector.load %arg13[%c0_106, %c0_107] : memref<8x1xf32, #tpu.memory_space<vmem>>, vector<8x1xf32>
    %cst_108 = arith.constant dense<0.000000e+00> : vector<8xf32>
    %270 = vector.multi_reduction <add>, %267, %cst_108 [1] : vector<8x32xf32> to vector<8xf32>
    %271 = vector.shape_cast %270 : vector<8xf32> to vector<8x1xf32>
    %cst_109 = arith.constant 3.125000e-02 : f32
    %272 = vector.broadcast %cst_109 : f32 to vector<8x1xf32>
    %273 = arith.mulf %271, %272 : vector<8x1xf32>
    %274 = arith.mulf %267, %267 : vector<8x32xf32>
    %cst_110 = arith.constant dense<0.000000e+00> : vector<8xf32>
    %275 = vector.multi_reduction <add>, %274, %cst_110 [1] : vector<8x32xf32> to vector<8xf32>
    %276 = vector.shape_cast %275 : vector<8xf32> to vector<8x1xf32>
    %cst_111 = arith.constant 3.125000e-02 : f32
    %277 = vector.broadcast %cst_111 : f32 to vector<8x1xf32>
    %278 = arith.mulf %276, %277 : vector<8x1xf32>
    %279 = arith.mulf %273, %273 : vector<8x1xf32>
    %280 = arith.subf %278, %279 : vector<8x1xf32>
    %cst_112 = arith.constant 9.99999974E-6 : f32
    %281 = vector.broadcast %cst_112 : f32 to vector<8x1xf32>
    %282 = arith.addf %280, %281 : vector<8x1xf32>
    %283 = math.rsqrt %282 : vector<8x1xf32>
    %284 = arith.mulf %268, %283 : vector<8x1xf32>
    %285 = arith.mulf %273, %284 : vector<8x1xf32>
    %286 = arith.subf %269, %285 : vector<8x1xf32>
    %287 = vector.broadcast %284 : vector<8x1xf32> to vector<8x32xf32>
    %288 = arith.mulf %267, %287 : vector<8x32xf32>
    %289 = vector.broadcast %286 : vector<8x1xf32> to vector<8x32xf32>
    %290 = arith.addf %288, %289 : vector<8x32xf32>
    %cst_113 = arith.constant 0.000000e+00 : f32
    %291 = vector.broadcast %cst_113 : f32 to vector<8x32xf32>
    %292 = arith.maximumf %290, %291 : vector<8x32xf32>
    %c0_114 = arith.constant 0 : index
    %c0_115 = arith.constant 0 : index
    %293 = vector.load %arg14[%c0_114, %c0_115] : memref<8x32xf32, #tpu.memory_space<vmem>>, vector<8x32xf32>
    tpu.vector_store %arg14[%c0_114, %c0_115], %292 {strides = array<i32>} : memref<8x32xf32, #tpu.memory_space<vmem>>, vector<8x32xf32>,
    return
  }
  func.func @transform_0(%arg0: i32) -> (i32, i32) {
    %c0_i32 = arith.constant 0 : i32
    %c0_i32_0 = arith.constant 0 : i32
    %c0_i32_1 = arith.constant 0 : i32
    return %c0_i32, %c0_i32_0 : i32, i32
  }
  func.func @transform_1(%arg0: i32) -> (i32, i32) {
    %c0_i32 = arith.constant 0 : i32
    %c0_i32_0 = arith.constant 0 : i32
    %c0_i32_1 = arith.constant 0 : i32
    return %c0_i32, %c0_i32_0 : i32, i32
  }
  func.func @transform_2(%arg0: i32) -> (i32, i32) {
    %c0_i32 = arith.constant 0 : i32
    %c0_i32_0 = arith.constant 0 : i32
    %c0_i32_1 = arith.constant 0 : i32
    return %c0_i32, %c0_i32_0 : i32, i32
  }
  func.func @transform_3(%arg0: i32) -> (i32, i32) {
    %c0_i32 = arith.constant 0 : i32
    %c0_i32_0 = arith.constant 0 : i32
    %c0_i32_1 = arith.constant 0 : i32
    return %c0_i32, %c0_i32_0 : i32, i32
  }
  func.func @transform_4(%arg0: i32) -> (i32, i32) {
    %c0_i32 = arith.constant 0 : i32
    %c0_i32_0 = arith.constant 0 : i32
    %c0_i32_1 = arith.constant 0 : i32
    return %c0_i32, %c0_i32_0 : i32, i32
  }
  func.func @transform_5(%arg0: i32) -> (i32, i32) {
    %c0_i32 = arith.constant 0 : i32
    %c0_i32_0 = arith.constant 0 : i32
    %c0_i32_1 = arith.constant 0 : i32
    return %c0_i32, %c0_i32_0 : i32, i32
  }
  func.func @transform_6(%arg0: i32) -> (i32, i32, i32) {
    %c0_i32 = arith.constant 0 : i32
    %c0_i32_0 = arith.constant 0 : i32
    %c0_i32_1 = arith.constant 0 : i32
    %c0_i32_2 = arith.constant 0 : i32
    return %c0_i32, %c0_i32_0, %c0_i32_1 : i32, i32, i32
  }
  func.func @transform_7(%arg0: i32) -> (i32, i32, i32) {
    %c0_i32 = arith.constant 0 : i32
    %c0_i32_0 = arith.constant 0 : i32
    %c0_i32_1 = arith.constant 0 : i32
    %c0_i32_2 = arith.constant 0 : i32
    return %c0_i32, %c0_i32_0, %c0_i32_1 : i32, i32, i32
  }
  func.func @transform_8(%arg0: i32) -> (i32, i32, i32) {
    %c0_i32 = arith.constant 0 : i32
    %c0_i32_0 = arith.constant 0 : i32
    %c0_i32_1 = arith.constant 0 : i32
    %c0_i32_2 = arith.constant 0 : i32
    return %c0_i32, %c0_i32_0, %c0_i32_1 : i32, i32, i32
  }
  func.func @transform_9(%arg0: i32) -> (i32, i32) {
    %c0_i32 = arith.constant 0 : i32
    %c0_i32_0 = arith.constant 0 : i32
    %c0_i32_1 = arith.constant 0 : i32
    return %c0_i32, %c0_i32_0 : i32, i32
  }
  func.func @transform_10(%arg0: i32) -> (i32, i32) {
    %c0_i32 = arith.constant 0 : i32
    %c0_i32_0 = arith.constant 0 : i32
    %c0_i32_1 = arith.constant 0 : i32
    return %c0_i32, %c0_i32_0 : i32, i32
  }
  func.func @transform_11(%arg0: i32) -> (i32, i32) {
    %c0_i32 = arith.constant 0 : i32
    %c0_i32_0 = arith.constant 0 : i32
    %c0_i32_1 = arith.constant 0 : i32
    return %c0_i32, %c0_i32_0 : i32, i32
  }
  func.func @transform_12(%arg0: i32) -> (i32, i32) {
    %c0_i32 = arith.constant 0 : i32
    %c0_i32_0 = arith.constant 0 : i32
    %c0_i32_1 = arith.constant 0 : i32
    return %c0_i32, %c0_i32_0 : i32, i32
  }
  func.func @transform_13(%arg0: i32) -> (i32, i32) {
    %c0_i32 = arith.constant 0 : i32
    %c0_i32_0 = arith.constant 0 : i32
    %c0_i32_1 = arith.constant 0 : i32
    return %c0_i32, %c0_i32_0 : i32, i32
  }
}

</mosaic_0001>

<bundles_post_ra>
// kernel: tpu_custom_call.1
= control target key start
LH: loop header
LB: loop body
LE: loop exit
PB: predicated region body
PF: predicated region fallthrough
CT: control target
= control target key end

     0   :  { %vm59_vm0 = vcmask 1043456   ;;  %v979_v2 = vmov 0.0   ;;  %vm980_vm1 = vmmov 0   ;;  %vm55_vm2 = vcmask 64512   ;;  %s1281_s0 = inlined_call_operand.vmem [shape: s32[1,32], index: 0, kind: input, shape index: {}]   ;;  %s1282_s1 = inlined_call_operand.vmem [shape: bf16[8,32], index: 1, kind: input, shape index: {}]   ;;  %s1283_s2 = inlined_call_operand.vmem [shape: bf16[16,8], index: 2, kind: input, shape index: {}]   ;;  %s1284_s3 = inlined_call_operand.vmem [shape: f32[8,1], index: 3, kind: input, shape index: {}]   ;;  %s1285_s4 = inlined_call_operand.vmem [shape: f32[8,1], index: 4, kind: input, shape index: {}]   ;;  %s1286_s5 = inlined_call_operand.vmem [shape: f32[8,1], index: 5, kind: input, shape index: {}]   ;;  %s1287_s6 = inlined_call_operand.vmem [shape: bf16[4,24,8], index: 6, kind: input, shape index: {}]   ;;  %s1288_s7 = inlined_call_operand.vmem [shape: f32[4,8,1], index: 7, kind: input, shape index: {}]   ;;  %s1289_s8 = inlined_call_operand.vmem [shape: f32[4,8,1], index: 8, kind: input, shape index: {}]   ;;  %s1290_s9 = inlined_call_operand.vmem [shape: bf16[8,8], index: 9, kind: input, shape index: {}]   ;;  %s1291_s10 = inlined_call_operand.vmem [shape: f32[8,1], index: 10, kind: input, shape index: {}]   ;;  %s1292_s11 = inlined_call_operand.vmem [shape: f32[8,1], index: 11, kind: input, shape index: {}]   ;;  %s1293_s12 = inlined_call_operand.vmem [shape: f32[8,1], index: 12, kind: input, shape index: {}]   ;;  %s1294_s13 = inlined_call_operand.hbm [shape: f32[8,32], index: 13, kind: output, shape index: {}]  }
   0x1   :  { %v49_v0 = vld [vmem:[%s1282_s1] sm:$0xf]  ;;  %875 = vmatprep.subr.bf16.mxu0 %v979_v2  ;;  %877 = vmatprep.mubr.msk.bf16.mxu0 %vm980_vm1, %v979_v2 }
   0x2   :  { %v930_v1 = vld [vmem:[%s1283_s2] sm:$0xff]   ;;  %v61_v3 = vsel %vm59_vm0, %v49_v0, 0 }
   0x3   :  { %876 = vmatpush3.bf16.msra.mxu0 %v61_v3 }
   0x6   :  { %878 = vmatmul.mubr.msk.bf16.vlgmr.msra.gmra.mrb[0].mxu0 %vm55_vm2, %v930_v1 }
   0x7   :  { %18 = vsyncpa [#allocation3], 0  ;;  %vm106_vm3 = vcmask 261120   ;;  %v981_v11 = vmov 0   ;;  %v104_v19 = vld [vmem:[%s1284_s3] sm:$0xff]  ;;  %v932_v26 = vld [vmem:[%s1287_s6 + $0xc] sm:$0xff]  }
   0x8   :  { %928 = vset.pattern.permute.xlu1 %v981_v11  ;;  %929 = vset.pattern.permute.xlu0 %v981_v11  ;;  %v105_v22 = vld [vmem:[%s1285_s4] sm:$0xff]  ;;  %v933_v34 = vld [vmem:[%s1287_s6 + $0x8] ss:$0 sps:$4 sm:$0xff]   ;;  %v934_v35 = vld [vmem:[%s1287_s6 + $0x14] ss:$0 sps:$4 sm:$0xff]   ;;  %s982_s28 = smov 32  }
   0x9   :  { %v931_v25 = vld [vmem:[%s1287_s6] sm:$0xff]   ;;  %889 = vmatprep.mubr.msk.bf16.mxu0 %vm55_vm2, %v932_v26  ;;  %v937_v37 = vld [vmem:[%s1287_s6 + $0x18] sm:$0xff]   ;;  %v936_v38 = vld [vmem:[%s1287_s6 + $0x2c] ss:$0 sps:$4 sm:$0xff]   ;;  %vm205_vm4 = vcmask 1047808   ;;  %s984_s1 = smov 97   ;;  %v214_v26 = vlaneseq }
   0xa   :  { %883 = vmatprep.mubr.msk.bf16.mxu1 %vm55_vm2, %v931_v25  ;;  %v935_v36 = vld [vmem:[%s1287_s6 + $0x24] sm:$0xff]   ;;  %v938_v39 = vld [vmem:[%s1287_s6 + $0x20] ss:$0 sps:$4 sm:$0xff]   ;;  %s983_s6 = smov 127   ;;  %s985_s2 = smov 126  }
   0xb   :  { %s986_s29 = smov 98   ;;  %s987_s30 = smov 124  }
   0xc   :  { %s988_s14 = smov 120   ;;  %s989_s15 = smov 100  }
   0xd   :  { %s990_s16 = smov 104   ;;  %s991_s17 = smov [#allocation2]  }
   0xe   :  { %s817_s3 = sshll.u32 %s991_s17, 4  ;;  %s818_s3 = int_to_ptr.vmem [resolvable:$true] %s817_s3 }
   0xf   :  { %p960_p1 = scmp.lt.s32.totalorder %s818_s3, %s818_s3 }
  0xd9   :  { %v97_v4 = vpop.f32.mrb[0].mxu0 }
  0xda   :  { %v879_v5 = vpop.f32.mrb[1].mxu0  ;;  %v107_v6 = vsel %vm106_vm3, %v97_v4, 0.0  ;;  %v111_v7 = vmul.f32 %v97_v4, %v97_v4 }
  0xdb   :  { %108 = vadd.xlane.f32.xlu0 %v107_v6  ;;  %v1074_v8 = vpop.f32.mrb[2].mxu0 }
  0xdc   :  { %v880_v9 = vpop.f32.mrb[3].mxu0  ;;  %v112_v10 = vsel %vm106_vm3, %v111_v7, 0.0 }
  0xdf   :  { %113 = vadd.xlane.f32.xlu0 %v112_v10 }
 0x168   :  { %v109_v12 = vpop.xlane.xlu0 %108 }
 0x169   :  { %v110_v13 = vmul.f32 0.03125, %v109_v12 }
 0x16b   :  { %v116_v15 = vmul.f32 %v110_v13, %v110_v13 }
 0x16c   :  { %v114_v14 = vpop.xlane.xlu0 %113 }
 0x16d   :  { %v115_v16 = vmul.f32 0.03125, %v114_v14 }
 0x16f   :  { %v117_v17 = vsub.f32 %v115_v16, %v116_v15 }
 0x171   :  { %v118_v18 = vadd.f32 1e-05, %v117_v17 }
 0x173   :  { %939 = vrsqrt.f32 %v118_v18 }
 0x17d   :  { %v940_v20 = vpop.eup %939 }
 0x17e   :  { %v120_v21 = vmul.f32 %v940_v20, %v104_v19 }
 0x180   :  { %125 = vperm.xlu1 %928, %v120_v21   ;;  %v121_v23 = vmul.f32 %v120_v21, %v110_v13 }
 0x182   :  { %v122_v24 = vsub.f32 %v105_v22, %v121_v23 }
 0x184   :  { %131 = vperm.xlu1 %928, %v122_v24  }
 0x1ff   :  { %v126_v27 = vpop.permute.xlu1 %125 }
 0x200   :  { %v128_v28 = vmul.f32 %v126_v27, %v97_v4  ;;  %v46_v27 = vld [vmem:[%s1281_s0] sm:$0x1] }
 0x201   :  { %vm212_vm5 = vcmp.ge.s32.totalorder %v46_v27, 1  ;;  %vm231_vm6 = vcmp.lt.s32.totalorder %v46_v27, 15  ;;  %vm347_vm7 = vcmp.ge.s32.totalorder %v46_v27, 2  ;;  %vm366_vm8 = vcmp.lt.s32.totalorder %v46_v27, 14 }
 0x202   :  { %vm484_vm11 = vcmp.ge.s32.totalorder %v46_v27, 4  ;;  %vm503_vm13 = vcmp.lt.s32.totalorder %v46_v27, 12  ;;  %vm621_vm15 = vcmp.ge.s32.totalorder %v46_v27, 8 }
 0x203   :  { %v132_v29 = vpop.permute.xlu1 %131 }
 0x204   :  { %v134_v30 = vadd.f32 %v132_v29, %v128_v28  ;;  %v215_v28 = vshrl.u32 %v214_v26, 7  ;;  %v213_v29 = vsel %vm212_vm5, 1, %v981_v11 }
 0x206   :  { %v1093_v31 = vmax.f32 %v134_v30, 0.0  ;;  %v216_v30 = vsub.s32 0, %v215_v28 }
 0x208   :  { %v136_v32 = vpack.c.bf16 %v1093_v31, %v1093_v31 }
 0x20a   :  { %911 = vmatprep.subr.msk.bf16.mxu1 %vm59_vm0, %v136_v32  ;;  %912 = vmatprep.subr.msk.bf16.mxu0 %vm59_vm0, %v136_v32  ;;  %v155_v33 = vsel %vm59_vm0, %v136_v32, 0 }
 0x20b   :  { %882 = vmatpush3.bf16.msra.mxu1 %v155_v33  ;;  %888 = vmatpush3.bf16.msra.mxu0 %v155_v33 }
 0x20c   :  { %913 = vmatprep.subr.msk.bf16.mxu1 %vm59_vm0, %v136_v32  ;;  %914 = vmatprep.subr.msk.bf16.mxu0 %vm59_vm0, %v136_v32  ;;  %v232_v32 = vsel %vm231_vm6, 1, %v981_v11 }
 0x20e   :  { %884 = vmatmul.mubr.msk.bf16.vlgmr.msra.gmra.mrb[0].mxu1 %vm55_vm2, %v933_v34  ;;  %890 = vmatmul.mubr.msk.bf16.vlgmr.msra.gmra.mrb[4].mxu0 %vm55_vm2, %v934_v35  ;;  %v236_v34 = vrot.slane %v232_v32, %v216_v30  ;;  %v348_v35 = vsel %vm347_vm7, 1, %v981_v11 }
 0x20f   :  { %894 = vmatpush3.bf16.msra.mxu1 %v155_v33  ;;  %900 = vmatpush3.bf16.msra.mxu0 %v155_v33  ;;  %v217_v33 = vrot.slane %v213_v29, %v216_v30 }
 0x210   :  { %901 = vmatprep.mubr.msk.bf16.mxu0 %vm55_vm2, %v935_v36  ;;  %895 = vmatprep.mubr.msk.bf16.mxu1 %vm55_vm2, %v937_v37  ;;  %v367_v36 = vsel %vm366_vm8, 1, %v981_v11  ;;  %vm237_vm10 = vcmp.eq.s32.totalorder %v236_v34, 1 }
 0x211   :  { %905 = vmatprep.subr.bf16.mxu1 %v979_v2  ;;  %vm218_vm9 = vcmp.eq.s32.totalorder %v217_v33, 1 }
 0x216   :  { %902 = vmatmul.mubr.msk.bf16.vlgmr.msra.gmra.mrb[8].mxu0 %vm55_vm2, %v936_v38  ;;  %896 = vmatmul.mubr.msk.bf16.vlgmr.msra.gmra.mrb[4].mxu1 %vm55_vm2, %v938_v39  ;;  %v352_v38 = vrot.slane %v348_v35, %v216_v30 }
 0x217   :  { %907 = vmatprep.mubr.msk.bf16.mxu1 %vm980_vm1, %v979_v2  ;;  %vm640_vm1 = vcmp.lt.s32.totalorder %v46_v27, 8 }
 0x218   :  { %vm353_vm12 = vcmp.eq.s32.totalorder %v352_v38, 1 }
 0x2e1   :  { %v885_v40 = vpop.f32.mrb[0].mxu1  ;;  %v891_v41 = vpop.f32.mrb[4].mxu0 }
 0x2e2   :  { %225 = vrot.lane.b32.xlu1 %v885_v40, %s982_s28  ;;  %v1130_v42 = vpop.f32.mrb[1].mxu1  ;;  %v1132_v43 = vpop.f32.mrb[5].mxu0 }
 0x2e3   :  { %v886_v44 = vpop.f32.mrb[2].mxu1  ;;  %v892_v45 = vpop.f32.mrb[6].mxu0 }
 0x2e4   :  { %v194_v46 = vpop.f32.mrb[3].mxu1  ;;  %v330_v47 = vpop.f32.mrb[7].mxu0 }
 0x2e5   :  { %206 = vrot.lane.b32.xlu0 %v194_v46, %s982_s28 }
 0x2e6   :  { %360 = vrot.lane.b32.xlu1 %v891_v41, %s982_s28 }
 0x2e9   :  { %v903_v48 = vpop.f32.mrb[8].mxu0  ;;  %v897_v49 = vpop.f32.mrb[4].mxu1 }
 0x2ea   :  { %341 = vrot.lane.b32.xlu1 %v330_v47, %s982_s28  ;;  %634 = vrot.lane.b32.xlu0 %v903_v48, %s982_s28  ;;  %v1138_v50 = vpop.f32.mrb[5].mxu1  ;;  %v1140_v51 = vpop.f32.mrb[9].mxu0 }
 0x2eb   :  { %v898_v52 = vpop.f32.mrb[6].mxu1  ;;  %v904_v53 = vpop.f32.mrb[10].mxu0 }
 0x2ec   :  { %v467_v54 = vpop.f32.mrb[7].mxu1  ;;  %v604_v55 = vpop.f32.mrb[11].mxu0 }
 0x2ee   :  { %497 = vrot.lane.b32.xlu1 %v897_v49, %s982_s28 }
 0x2f2   :  { %478 = vrot.lane.b32.xlu1 %v467_v54, %s982_s28 }
 0x2f6   :  { %615 = vrot.lane.b32.xlu1 %v604_v55, %s982_s28 }
 0x354   :  { %v226_v56 = vpop.permute.xlu1 %225 }
 0x355   :  { %v227_v57 = vsel %vm205_vm4, %v226_v56, %v885_v40 }
 0x356   :  { %228 = vrot.lane.b32.xlu0 %v227_v57, %s982_s28  ;;  %v622_v57 = vsel %vm621_vm15, 1, %v981_v11 }
 0x357   :  { %v207_v58 = vpop.permute.xlu0 %206 }
 0x358   :  { %v361_v59 = vpop.permute.xlu1 %360  ;;  %v208_v60 = vsel %vm205_vm4, %v207_v58, %v194_v46 }
 0x359   :  { %209 = vrot.lane.b32.xlu1 %v208_v60, %s982_s28  ;;  %v362_v61 = vsel %vm205_vm4, %v361_v59, %v891_v41  ;;  %v641_v60 = vsel %vm640_vm1, 1, %v981_v11 }
 0x35a   :  { %363 = vrot.lane.b32.xlu0 %v362_v61, %s982_s28 }
 0x35c   :  { %v342_v62 = vpop.permute.xlu1 %341  ;;  %v635_v2 = vpop.permute.xlu0 %634 }
 0x35d   :  { %v343_v63 = vsel %vm205_vm4, %v342_v62, %v330_v47  ;;  %v636_v4 = vsel %vm205_vm4, %v635_v2, %v903_v48 }
 0x35e   :  { %344 = vrot.lane.b32.xlu1 %v343_v63, %s982_s28 }
 0x360   :  { %v498_v0 = vpop.permute.xlu1 %497 }
 0x361   :  { %v499_v1 = vsel %vm205_vm4, %v498_v0, %v897_v49  ;;  %v626_v0 = vrot.slane %v622_v57, %v216_v30 }
 0x362   :  { %500 = vrot.lane.b32.xlu0 %v499_v1, %s982_s28  ;;  %v645_v1 = vrot.slane %v641_v60, %v216_v30  ;;  %v245_v60 = vld [vmem:[%s1289_s8] sm:$0xff] }
 0x363   :  { %vm627_vm6 = vcmp.eq.s32.totalorder %v626_v0, 1 }
 0x364   :  { %v479_v3 = vpop.permute.xlu1 %478  ;;  %vm646_vm7 = vcmp.eq.s32.totalorder %v645_v1, 1 }
 0x365   :  { %v480_v5 = vsel %vm205_vm4, %v479_v3, %v467_v54 }
 0x366   :  { %637 = vrot.lane.b32.xlu0 %v636_v4, %s982_s28  ;;  %481 = vrot.lane.b32.xlu1 %v480_v5, %s982_s28 }
 0x368   :  { %v616_v6 = vpop.permute.xlu1 %615 }
 0x369   :  { %v617_v7 = vsel %vm205_vm4, %v616_v6, %v604_v55 }
 0x36a   :  { %618 = vrot.lane.b32.xlu1 %v617_v7, %s982_s28 }
 0x3c8   :  { %v229_v9 = vpop.permute.xlu0 %228 }
 0x3c9   :  { %v230_v10 = vsel %vm205_vm4, %v229_v9, %v885_v40 }
 0x3ca   :  { %239 = vrot.lane.b32.xlu0 %v230_v10, %s983_s6 }
 0x3cb   :  { %v210_v12 = vpop.permute.xlu1 %209 }
 0x3cc   :  { %v364_v13 = vpop.permute.xlu0 %363  ;;  %v211_v14 = vsel %vm205_vm4, %v210_v12, %v194_v46  ;;  %v485_v46 = vsel %vm484_vm11, 1, %v981_v11 }
 0x3cd   :  { %220 = vrot.lane.b32.xlu1 %v211_v14, %s984_s1  ;;  %v365_v15 = vsel %vm205_vm4, %v364_v13, %v891_v41  ;;  %v371_v41 = vrot.slane %v367_v36, %v216_v30 }
 0x3ce   :  { %374 = vrot.lane.b32.xlu0 %v365_v15, %s985_s2 }
 0x3cf   :  { %vm372_vm14 = vcmp.eq.s32.totalorder %v371_v41, 1 }
 0x3d0   :  { %v345_v16 = vpop.permute.xlu1 %344 }
 0x3d1   :  { %v346_v17 = vsel %vm205_vm4, %v345_v16, %v330_v47 }
 0x3d2   :  { %355 = vrot.lane.b32.xlu1 %v346_v17, %s986_s29 }
 0x3d4   :  { %v501_v18 = vpop.permute.xlu0 %500 }
 0x3d5   :  { %v502_v19 = vsel %vm205_vm4, %v501_v18, %v897_v49 }
 0x3d6   :  { %511 = vrot.lane.b32.xlu0 %v502_v19, %s987_s30 }
 0x3d8   :  { %v638_v20 = vpop.permute.xlu0 %637  ;;  %v482_v21 = vpop.permute.xlu1 %481 }
 0x3d9   :  { %v639_v22 = vsel %vm205_vm4, %v638_v20, %v903_v48  ;;  %v483_v23 = vsel %vm205_vm4, %v482_v21, %v467_v54  ;;  %v504_v54 = vsel %vm503_vm13, 1, %v981_v11 }
 0x3da   :  { %648 = vrot.lane.b32.xlu0 %v639_v22, %s988_s14  ;;  %492 = vrot.lane.b32.xlu1 %v483_v23, %s989_s15  ;;  %v508_v59 = vrot.slane %v504_v54, %v216_v30 }
 0x3dc   :  { %v619_v24 = vpop.permute.xlu1 %618  ;;  %vm509_vm5 = vcmp.eq.s32.totalorder %v508_v59, 1 }
 0x3dd   :  { %v620_v25 = vsel %vm205_vm4, %v619_v24, %v604_v55  ;;  %v489_v55 = vrot.slane %v485_v46, %v216_v30 }
 0x3de   :  { %629 = vrot.lane.b32.xlu1 %v620_v25, %s990_s16 }
 0x3df   :  { %vm490_vm4 = vcmp.eq.s32.totalorder %v489_v55, 1  ;;  %v244_v55 = vld [vmem:[%s1288_s7] sm:$0xff] }
 0x43c   :  { %v240_v37 = vpop.permute.xlu0 %239 }
 0x43d   :  { %v242_v45 = vsel %vm237_vm10, %v240_v37, 0.0 }
 0x43f   :  { %v221_v39 = vpop.permute.xlu1 %220 }
 0x440   :  { %v223_v40 = vsel %vm218_vm9, %v221_v39, 0.0  ;;  %v375_v48 = vpop.permute.xlu0 %374 }
 0x441   :  { %v224_v44 = vadd.f32 %v223_v40, %v1130_v42  ;;  %v377_v56 = vsel %vm372_vm14, %v375_v48, 0.0 }
 0x443   :  { %v1178_v47 = vadd.f32 %v242_v45, %v224_v44 }
 0x444   :  { %v356_v49 = vpop.permute.xlu1 %355 }
 0x445   :  { %v358_v52 = vsel %vm353_vm12, %v356_v49, 0.0  ;;  %v246_v53 = vsel %vm106_vm3, %v1178_v47, 0.0 }
 0x446   :  { %v359_v42 = vadd.f32 %v358_v52, %v1132_v43  ;;  %247 = vadd.xlane.f32.xlu1 %v246_v53  ;;  %v250_v43 = vmul.f32 %v1178_v47, %v1178_v47  ;;  %v838_v53 = vld [vmem:[%s1288_s7 + $0x8] sm:$0xff] }
 0x448   :  { %v1185_v58 = vadd.f32 %v377_v56, %v359_v42  ;;  %v512_v61 = vpop.permute.xlu0 %511  ;;  %v251_v5 = vsel %vm106_vm3, %v250_v43, 0.0  ;;  %v839_v43 = vld [vmem:[%s1289_s8 + $0x8] sm:$0xff] }
 0x449   :  { %v514_v6 = vsel %vm509_vm5, %v512_v61, 0.0 }
 0x44a   :  { %v383_v62 = vsel %vm106_vm3, %v1185_v58, 0.0  ;;  %v387_v63 = vmul.f32 %v1185_v58, %v1185_v58 }
 0x44b   :  { %384 = vadd.xlane.f32.xlu0 %v383_v62 }
 0x44c   :  { %v493_v2 = vpop.permute.xlu1 %492  ;;  %v388_v3 = vsel %vm106_vm3, %v387_v63, 0.0  ;;  %v649_v7 = vpop.permute.xlu0 %648 }
 0x44d   :  { %v495_v4 = vsel %vm490_vm4, %v493_v2, 0.0  ;;  %389 = vadd.xlane.f32.xlu1 %v388_v3  ;;  %v847_v2 = vld [vmem:[%s1288_s7 + $0x10] sm:$0xff] }
 0x44e   :  { %v496_v11 = vadd.f32 %v495_v4, %v1138_v50  ;;  %v651_v50 = vsel %vm646_vm7, %v649_v7, 0.0  ;;  %v848_v7 = vld [vmem:[%s1289_s8 + $0x10] sm:$0xff] }
 0x44f   :  { %252 = vadd.xlane.f32.xlu0 %v251_v5 }
 0x450   :  { %v1197_v9 = vadd.f32 %v514_v6, %v496_v11  ;;  %v630_v10 = vpop.permute.xlu1 %629  ;;  %v856_v11 = vld [vmem:[%s1288_s7 + $0x18] sm:$0xff] }
 0x451   :  { %v632_v12 = vsel %vm627_vm6, %v630_v10, 0.0 }
 0x452   :  { %v633_v13 = vadd.f32 %v632_v12, %v1140_v51  ;;  %v520_v14 = vsel %vm106_vm3, %v1197_v9, 0.0  ;;  %v524_v15 = vmul.f32 %v1197_v9, %v1197_v9 }
 0x453   :  { %521 = vadd.xlane.f32.xlu0 %v520_v14 }
 0x454   :  { %v1204_v16 = vadd.f32 %v651_v50, %v633_v13  ;;  %v525_v17 = vsel %vm106_vm3, %v524_v15, 0.0  ;;  %v857_v13 = vld [vmem:[%s1289_s8 + $0x18] sm:$0xff]  ;;  %v737_v15 = vsel %vm106_vm3, %v1074_v8, 0.0  ;;  %v741_v50 = vmul.f32 %v1074_v8, %v1074_v8 }
 0x455   :  { %526 = vadd.xlane.f32.xlu1 %v525_v17 }
 0x456   :  { %v657_v18 = vsel %vm106_vm3, %v1204_v16, 0.0  ;;  %v661_v19 = vmul.f32 %v1204_v16, %v1204_v16  ;;  %v742_v17 = vsel %vm106_vm3, %v741_v50, 0.0 }
 0x457   :  { %658 = vadd.xlane.f32.xlu0 %v657_v18 }
 0x458   :  { %v662_v51 = vsel %vm106_vm3, %v661_v19, 0.0 }
 0x459   :  { %663 = vadd.xlane.f32.xlu1 %v662_v51 }
 0x4d3   :  { %v248_v20 = vpop.xlane.xlu1 %247 }
 0x4d4   :  { %v249_v22 = vmul.f32 0.03125, %v248_v20 }
 0x4d6   :  { %v255_v28 = vmul.f32 %v249_v22, %v249_v22 }
 0x4d8   :  { %v385_v21 = vpop.xlane.xlu0 %384 }
 0x4d9   :  { %v386_v23 = vmul.f32 0.03125, %v385_v21 }
 0x4da   :  { %v390_v24 = vpop.xlane.xlu1 %389 }
 0x4db   :  { %v392_v25 = vmul.f32 %v386_v23, %v386_v23  ;;  %v391_v26 = vmul.f32 0.03125, %v390_v24 }
 0x4dc   :  { %v253_v27 = vpop.xlane.xlu0 %252 }
 0x4dd   :  { %v393_v29 = vsub.f32 %v391_v26, %v392_v25  ;;  %v254_v30 = vmul.f32 0.03125, %v253_v27 }
 0x4df   :  { %v394_v32 = vadd.f32 1e-05, %v393_v29  ;;  %v256_v33 = vsub.f32 %v254_v30, %v255_v28 }
 0x4e0   :  { %v522_v34 = vpop.xlane.xlu0 %521 }
 0x4e1   :  { %941 = vrsqrt.f32 %v394_v32  ;;  %v257_v35 = vadd.f32 1e-05, %v256_v33  ;;  %v523_v36 = vmul.f32 0.03125, %v522_v34 }
 0x4e2   :  { %v527_v37 = vpop.xlane.xlu1 %526 }
 0x4e3   :  { %943 = vrsqrt.f32 %v257_v35  ;;  %v529_v38 = vmul.f32 %v523_v36, %v523_v36  ;;  %v528_v39 = vmul.f32 0.03125, %v527_v37 }
 0x4e4   :  { %v659_v40 = vpop.xlane.xlu0 %658 }
 0x4e5   :  { %v530_v41 = vsub.f32 %v528_v39, %v529_v38  ;;  %v660_v44 = vmul.f32 0.03125, %v659_v40 }
 0x4e6   :  { %v664_v45 = vpop.xlane.xlu1 %663 }
 0x4e7   :  { %v666_v46 = vmul.f32 %v660_v44, %v660_v44  ;;  %v665_v48 = vmul.f32 0.03125, %v664_v45  ;;  %v531_v49 = vadd.f32 1e-05, %v530_v41 }
 0x4e9   :  { %v667_v52 = vsub.f32 %v665_v48, %v666_v46  ;;  %945 = vrsqrt.f32 %v531_v49 }
 0x4eb   :  { %v942_v54 = vpop.eup %941  ;;  %v668_v57 = vadd.f32 1e-05, %v667_v52 }
 0x4ec   :  { %v396_v42 = vmul.f32 %v942_v54, %v838_v53 }
 0x4ed   :  { %v944_v56 = vpop.eup %943  ;;  %947 = vrsqrt.f32 %v668_v57  ;;  %v736_v57 = vld [vmem:[%s1286_s5] sm:$0xff] }
 0x4ee   :  { %401 = vperm.xlu1 %928, %v396_v42   ;;  %v259_v59 = vmul.f32 %v944_v56, %v244_v55  ;;  %v397_v63 = vmul.f32 %v396_v42, %v386_v23 }
 0x4f0   :  { %264 = vperm.xlu0 %929, %v259_v59   ;;  %v260_v61 = vmul.f32 %v259_v59, %v249_v22  ;;  %v398_v0 = vsub.f32 %v839_v43, %v397_v63 }
 0x4f2   :  { %v261_v62 = vsub.f32 %v245_v60, %v260_v61 }
 0x4f3   :  { %v946_v1 = vpop.eup %945 }
 0x4f4   :  { %270 = vperm.xlu1 %928, %v261_v62   ;;  %v533_v3 = vmul.f32 %v946_v1, %v847_v2  ;;  %v757_v2 = vld [vmem:[%s1291_s10] sm:$0xff] }
 0x4f6   :  { %v534_v6 = vmul.f32 %v533_v3, %v523_v36 }
 0x4f7   :  { %v948_v4 = vpop.eup %947 }
 0x4f8   :  { %407 = vperm.xlu1 %928, %v398_v0   ;;  %v670_v5 = vmul.f32 %v948_v4, %v856_v11  ;;  %v535_v10 = vsub.f32 %v848_v7, %v534_v6 }
 0x4fa   :  { %v671_v12 = vmul.f32 %v670_v5, %v660_v44 }
 0x4fc   :  { %538 = vperm.xlu1 %928, %v533_v3   ;;  %v672_v14 = vsub.f32 %v857_v13, %v671_v12 }
 0x500   :  { %675 = vperm.xlu1 %928, %v670_v5  }
 0x504   :  { %544 = vperm.xlu1 %928, %v535_v10  }
 0x508   :  { %681 = vperm.xlu1 %928, %v672_v14  }
 0x50f   :  { %738 = vadd.xlane.f32.xlu0 %v737_v15 }
 0x513   :  { %743 = vadd.xlane.f32.xlu0 %v742_v17 }
 0x56d   :  { %v402_v18 = vpop.permute.xlu1 %401 }
 0x56e   :  { %v404_v24 = vmul.f32 %v402_v18, %v1185_v58 }
 0x56f   :  { %v265_v20 = vpop.permute.xlu0 %264 }
 0x570   :  { %v267_v22 = vmul.f32 %v265_v20, %v1178_v47 }
 0x573   :  { %v271_v19 = vpop.permute.xlu1 %270 }
 0x574   :  { %v273_v25 = vadd.f32 %v271_v19, %v267_v22 }
 0x576   :  { %v274_v29 = vadd.f32 %v273_v25, %v1093_v31 }
 0x577   :  { %v408_v51 = vpop.permute.xlu1 %407 }
 0x578   :  { %v410_v26 = vadd.f32 %v408_v51, %v404_v24 }
 0x57a   :  { %v411_v32 = vadd.f32 %v410_v26, %v274_v29 }
 0x57b   :  { %v539_v21 = vpop.permute.xlu1 %538 }
 0x57c   :  { %v541_v27 = vmul.f32 %v539_v21, %v1197_v9  ;;  %v688_v9 = vld [vmem:[%s1290_s9] sm:$0xf] }
 0x57f   :  { %v676_v23 = vpop.permute.xlu1 %675 }
 0x580   :  { %v678_v33 = vmul.f32 %v676_v23, %v1204_v16  ;;  %v780_v23 = vld [vmem:[%s1293_s12] sm:$0xff] }
 0x583   :  { %v545_v28 = vpop.permute.xlu1 %544 }
 0x584   :  { %v547_v30 = vadd.f32 %v545_v28, %v541_v27 }
 0x586   :  { %v548_v35 = vadd.f32 %v547_v30, %v411_v32 }
 0x587   :  { %v682_v34 = vpop.permute.xlu1 %681 }
 0x588   :  { %v684_v36 = vadd.f32 %v682_v34, %v678_v33 }
 0x58a   :  { %v685_v37 = vadd.f32 %v684_v36, %v548_v35 }
 0x58c   :  { %v686_v38 = vmul.f32 0.25, %v685_v37 }
 0x58e   :  { %v687_v47 = vmax.f32 %v686_v38, 0.0 }
 0x590   :  { %v689_v39 = vpack.c.bf16 %v687_v47, %v687_v47 }
 0x592   :  { %v694_v58 = vsel %vm59_vm0, %v689_v39, 0 }
 0x593   :  { %906 = vmatpush3.bf16.msra.mxu1 %v694_v58 }
 0x596   :  { %908 = vmatmul.mubr.msk.bf16.vlgmr.msra.gmra.mrb[8].mxu1 %vm55_vm2, %v688_v9 }
 0x59c   :  { %v739_v31 = vpop.xlane.xlu0 %738 }
 0x59d   :  { %v740_v41 = vmul.f32 0.03125, %v739_v31 }
 0x59f   :  { %v746_v44 = vmul.f32 %v740_v41, %v740_v41 }
 0x5a0   :  { %v744_v40 = vpop.xlane.xlu0 %743 }
 0x5a1   :  { %v745_v16 = vmul.f32 0.03125, %v744_v40 }
 0x5a3   :  { %v747_v45 = vsub.f32 %v745_v16, %v746_v44 }
 0x5a5   :  { %v748_v46 = vadd.f32 1e-05, %v747_v45 }
 0x5a7   :  { %949 = vrsqrt.f32 %v748_v46 }
 0x5b1   :  { %v950_v56 = vpop.eup %949 }
 0x5b2   :  { %v750_v59 = vmul.f32 %v950_v56, %v736_v57 }
 0x669   :  { %v730_v48 = vpop.f32.mrb[8].mxu1 }
 0x66a   :  { %v758_v49 = vsel %vm106_vm3, %v730_v48, 0.0  ;;  %v909_v52 = vpop.f32.mrb[9].mxu1  ;;  %v762_v53 = vmul.f32 %v730_v48, %v730_v48 }
 0x66b   :  { %759 = vadd.xlane.f32.xlu1 %v758_v49  ;;  %v733_v54 = vpop.f32.mrb[10].mxu1 }
 0x66c   :  { %v763_v55 = vsel %vm106_vm3, %v762_v53, 0.0  ;;  %v910_v42 = vpop.f32.mrb[11].mxu1 }
 0x66d   :  { %764 = vadd.xlane.f32.xlu0 %v763_v55 }
 0x67c   :  { %753 = vperm.xlu1 %928, %v750_v59  }
 0x6f8   :  { %v760_v60 = vpop.xlane.xlu1 %759 }
 0x6f9   :  { %v761_v61 = vmul.f32 0.03125, %v760_v60 }
 0x6fa   :  { %v765_v62 = vpop.xlane.xlu0 %764 }
 0x6fb   :  { %v767_v63 = vmul.f32 %v761_v61, %v761_v61  ;;  %v766_v43 = vmul.f32 0.03125, %v765_v62 }
 0x6fc   :  { %v754_v11 = vpop.permute.xlu1 %753 }
 0x6fd   :  { %v768_v0 = vsub.f32 %v766_v43, %v767_v63  ;;  %v756_v6 = vmul.f32 %v754_v11, %v1074_v8  ;;  %v779_v8 = vld [vmem:[%s1292_s11] sm:$0xff]  ;;  %s955_s11 = scalar_lea.vmem %s818_s3, 128 }
 0x6fe   :  { %p956_p0 = scmp.ne.s32.totalorder %s818_s3, %s955_s11  ;;  %p961_p2 = scmp.lt.s32.totalorder %s955_s11, %s955_s11 }
 0x6ff   :  { %v769_v1 = vadd.f32 1e-05, %v768_v0 }
 0x700   :  { %p962_p3 = por %p961_p2, %p960_p1 }
 0x701   :  { %951 = vrsqrt.f32 %v769_v1 }
 0x702   :  { %p963_p4 = pnand %p962_p3, %p956_p0 }
 0x70b   :  { %v952_v3 = vpop.eup %951 }
 0x70c   :  { %v771_v4 = vmul.f32 %v952_v3, %v757_v2 }
 0x70e   :  { %774 = vperm.xlu0 %929, %v771_v4  }
 0x78d   :  { %v775_v5 = vpop.permute.xlu0 %774 }
 0x78e   :  { %v777_v7 = vmul.f32 %v775_v5, %v730_v48 }
 0x790   :  { %v778_v10 = vadd.f32 %v777_v7, %v756_v6 }
 0x792   :  { %v781_v12 = vsel %vm106_vm3, %v778_v10, 0.0  ;;  %v785_v13 = vmul.f32 %v778_v10, %v778_v10 }
 0x793   :  { %782 = vadd.xlane.f32.xlu1 %v781_v12 }
 0x794   :  { %v786_v14 = vsel %vm106_vm3, %v785_v13, 0.0 }
 0x795   :  { %787 = vadd.xlane.f32.xlu0 %v786_v14 }
 0x820   :  { %v783_v15 = vpop.xlane.xlu1 %782 }
 0x821   :  { %v784_v50 = vmul.f32 0.03125, %v783_v15 }
 0x822   :  { %v788_v17 = vpop.xlane.xlu0 %787 }
 0x823   :  { %v790_v18 = vmul.f32 %v784_v50, %v784_v50  ;;  %v789_v19 = vmul.f32 0.03125, %v788_v17 }
 0x825   :  { %v791_v51 = vsub.f32 %v789_v19, %v790_v18 }
 0x827   :  { %v792_v20 = vadd.f32 1e-05, %v791_v51 }
 0x829   :  { %953 = vrsqrt.f32 %v792_v20 }
 0x833   :  { %v954_v21 = vpop.eup %953 }
 0x834   :  { %v794_v22 = vmul.f32 %v954_v21, %v779_v8 }
 0x836   :  { %799 = vperm.xlu1 %928, %v794_v22   ;;  %v795_v24 = vmul.f32 %v794_v22, %v784_v50 }
 0x838   :  { %v796_v25 = vsub.f32 %v780_v23, %v795_v24 }
 0x83a   :  { %805 = vperm.xlu0 %929, %v796_v25  }
 0x8b5   :  { %v800_v26 = vpop.permute.xlu1 %799 }
 0x8b6   :  { %v802_v27 = vmul.f32 %v800_v26, %v778_v10 }
 0x8b9   :  { %v806_v28 = vpop.permute.xlu0 %805 }
 0x8ba   :  { %v808_v29 = vadd.f32 %v806_v28, %v802_v27 }
 0x8bc   :  { %v809_v30 = vmax.f32 %v808_v29, 0.0 }
 0x8be   :  { %810 = vst.msk [vmem:[#allocation2] sm:$0xff] %vm106_vm3, %v809_v30 }
 0x8bf   :  { %966 = shalt.err (!%p963_p4)
}
 0x8c0   :  { %s967_s4 = scalar_lea.hbm %s1294_s13, 128 }
 0x8c1   :  { %p968_p5 = scmp.ne.s32.totalorder %s1294_s13, %s967_s4  ;;  %p971_p6 = scmp.lt.u32.totalorder %s967_s4, %s1294_s13 }
 0x8c3   :  { %p973_p7 = pnand %p971_p6, %p968_p5 }
 0x8c5   :  { %976 = shalt.err (!%p973_p7)
}
 0x8c6   :  { %820 = dma.vmem_to_hbm [thread:$0]  %s818_s3, 128, %s1294_s13, [#allocation3]  }
 0x8c7   :  { %977 = dma.done.wait [#allocation3], 128  }
 0x8c8   :  { %978 = vsyncadd [#allocation3], 4294967168 }
 0x8c9   :  { %824 = vsyncpa [#allocation3], 1 }

</bundles_post_ra>
